<compile_context>
chip_gen: v7x
topology: tpu7x:2x2x1
jax: 0.10.0
libtpu: 0.0.40
codegen_flags: <defaults>
</compile_context>

<pallas_src>
import functools

import jax
import jax.numpy as jnp
import numpy as np
from jax import lax
from jax.experimental import pallas as pl
from jax.experimental.pallas import tpu as pltpu


def _gridding_reverse_kernel(g_ref, o_ref, *, scale):
    """g_ref: (bt*S, S*S) f32 (sublane=b*S+z, lane=y*S+x).  o_ref: (3, bt*S, S*S) f32."""
    S = scale
    g = g_ref[...]

    # Four 4-corner sums via 6 rolls + 6 adds (was 10 rolls / ~16 adds).
    # corner(dz,dy,dx) == roll(g, (dz sublane, dy*S+dx lane)); valid cells never see wrap.
    px = g + pltpu.roll(g, shift=S, axis=1)        # corners with x-vertex == x, z-vertex == z
    py = g + pltpu.roll(g, shift=1, axis=1)        # corners with y-vertex == y, z-vertex == z
    wz1 = px + pltpu.roll(px, shift=1, axis=1)     # all corners with z-vertex == z
    sum_w = wz1 + pltpu.roll(wz1, shift=1, axis=0) # all 8 corners
    wx1 = px + pltpu.roll(px, shift=1, axis=0)     # all corners with x-vertex == x
    wy1 = py + pltpu.roll(py, shift=1, axis=0)     # all corners with y-vertex == y

    rowi = lax.broadcasted_iota(jnp.int32, g.shape, 0)   # b*S + z
    flat = lax.broadcasted_iota(jnp.int32, g.shape, 1)   # y*S + x
    if (S & (S - 1)) == 0:                               # pow2: shift/mask, no vector divide
        lb = S.bit_length() - 1
        zi = rowi & (S - 1)
        yi = flat >> lb
        xi = flat & (S - 1)
    else:
        zi = rowi % S
        yi = flat // S
        xi = flat % S

    valid = (xi >= 1) & (yi >= 1) & (zi >= 1) & (sum_w != 0.0)

    out_scale = jnp.float32(2.0 / S)          # fuses the module's `ptcloud / scale * 2`
    shift = jnp.float32(0.5 * S + 1.0)        # (f - 1 - S/2)
    # Original: ((w_hi*f + (sum_w - w_hi)*(f-1)) / sum_w - S/2) * out_scale
    # Simplified (sum_w != 0, the only surviving case):
    #   (f - 1 - S/2) * out_scale + w_hi * (out_scale / sum_w)
    inv_s = out_scale / jnp.where(sum_w == 0.0, 1.0, sum_w)

    def coord(idx, w_hi):
        c = (idx.astype(jnp.float32) - shift) * out_scale
        return jnp.where(valid, c + w_hi * inv_s, 0.0)

    o_ref[0] = coord(xi, wx1)
    o_ref[1] = coord(yi, wy1)
    o_ref[2] = coord(zi, wz1)


def gridding_reverse(grid, scale):
    """grid: (B, S, S, S) float32  ->  ptcloud: (B, S**3, 3) float32 in [-1, 1]."""
    B = grid.shape[0]
    S = scale
    assert grid.shape == (B, S, S, S)
    g2 = grid.astype(jnp.float32).reshape(B * S, S * S)   # glue: layout plumbing only

    # Pack as many batch elements per grid step as fit a conservative VMEM budget
    # (amortizes the ~0.35us per-step overhead at small S).
    per_batch_db = 2 * (1 + 3) * S * S * S * 4            # in + 3-plane out, double-buffered
    max_bt = max(1, (12 << 20) // per_batch_db)
    bt = 1
    for d in range(1, B + 1):
        if B % d == 0 and d <= max_bt:
            bt = d

    cp = dict(dimension_semantics=("parallel",))          # batch steps are independent
    db_bytes = bt * per_batch_db
    if db_bytes > (16 << 20):                              # large-S safety margin
        cp["vmem_limit_bytes"] = db_bytes + (4 << 20)

    out = pl.pallas_call(
        functools.partial(_gridding_reverse_kernel, scale=S),
        out_shape=jax.ShapeDtypeStruct((3, B * S, S * S), jnp.float32),
        grid_spec=pltpu.PrefetchScalarGridSpec(
            num_scalar_prefetch=0,
            grid=(B // bt,),
            in_specs=[pl.BlockSpec((bt * S, S * S), lambda i: (i, 0))],
            out_specs=pl.BlockSpec((3, bt * S, S * S), lambda i: (0, i, 0)),
        ),
        compiler_params=pltpu.CompilerParams(**cp),
    )(g2)

    # (3, B*S, S*S) -> (B, S**3, 3); cell j = z*S*S + y*S + x, coord order (x, y, z).
    # TODO(synk): this transpose is PyTorch-parity layout plumbing (doubles HBM traffic);
    # drop it if the consumer can accept the planar (3, B, S**3) layout directly.
    return out.reshape(3, B, S ** 3).transpose(1, 2, 0)


def gridding_reverse_ref(grid, scale):
    """Pure-JAX reference with the original (unsimplified) per-cell formula."""
    S = scale
    B = grid.shape[0]
    grid = grid.astype(jnp.float32)

    def corner(dz, dy, dx):
        return jnp.roll(grid, shift=(dz, dy, dx), axis=(1, 2, 3))

    w111 = corner(0, 0, 0); w110 = corner(0, 0, 1)
    w101 = corner(0, 1, 0); w100 = corner(0, 1, 1)
    w011 = corner(1, 0, 0); w010 = corner(1, 0, 1)
    w001 = corner(1, 1, 0); w000 = corner(1, 1, 1)

    sum_w = w000 + w001 + w010 + w011 + w100 + w101 + w110 + w111
    wx1 = w001 + w011 + w101 + w111
    wy1 = w010 + w011 + w110 + w111
    wz1 = w100 + w101 + w110 + w111

    zi, yi, xi = jnp.meshgrid(jnp.arange(S), jnp.arange(S), jnp.arange(S), indexing="ij")
    zi, yi, xi = zi[None], yi[None], xi[None]

    valid = (xi >= 1) & (yi >= 1) & (zi >= 1) & (sum_w != 0.0)
    inv = 1.0 / jnp.where(sum_w == 0.0, 1.0, sum_w)
    half = jnp.float32(0.5 * S)
    out_scale = jnp.float32(2.0 / S)

    def coord(idx, w_hi):
        f = idx.astype(jnp.float32)
        raw = (w_hi * f + (sum_w - w_hi) * (f - 1.0)) * inv - half
        return jnp.where(valid, raw * out_scale, 0.0)

    px, py, pz = coord(xi, wx1), coord(yi, wy1), coord(zi, wz1)
    return jnp.stack([px, py, pz], axis=-1).reshape(B, S ** 3, 3)


if __name__ == "__main__":
    B, S = 2, 16  # batch=2, scale=16 -> grid (2, 16, 16, 16), ptcloud (2, 4096, 3)
    k1, k2 = jax.random.split(jax.random.PRNGKey(0))
    vals = jax.random.uniform(k1, (B, S, S, S), dtype=jnp.float32)
    mask = (jax.random.uniform(k2, (B, S, S, S)) > 0.5).astype(jnp.float32)
    grid = vals * mask  # sparse occupancy-like weights (exercises the sum==0 path)

    ptcloud = gridding_reverse(grid, S)
    ptcloud = jax.block_until_ready(ptcloud)

    assert ptcloud.shape == (B, S ** 3, 3) and ptcloud.dtype == jnp.float32

    ref = jax.block_until_ready(gridding_reverse_ref(grid, S))
    assert np.allclose(np.asarray(ptcloud), np.asarray(ref), rtol=1e-5, atol=1e-5), (
        "Pallas kernel does not match reference"
    )

    print("KERNEL_OK")
</pallas_src>

<mosaic_0001>
module attributes {stable_mosaic.version = 11 : i64} {
  func.func @_gridding_reverse_kernel(%arg0: i32, %arg1: memref<32x256xf32, #tpu.memory_space<vmem>>, %arg2: memref<3x32x256xf32, #tpu.memory_space<vmem>>) attributes {dimension_semantics = [#tpu.dimension_semantics<parallel>], iteration_bounds = array<i64: 1>, scalar_prefetch = 0 : i64, scratch_operands = 0 : i64, tpu.core_type = #tpu.core_type<tc>, window_params = [{transform_indices = @transform_0, window_bounds = array<i64: 32, 256>}, {transform_indices = @transform_1, window_bounds = array<i64: 3, 32, 256>}]} {
    %c0 = arith.constant 0 : index
    %c0_0 = arith.constant 0 : index
    %0 = vector.load %arg1[%c0, %c0_0] : memref<32x256xf32, #tpu.memory_space<vmem>>, vector<32x256xf32>
    %c16_i32 = arith.constant 16 : i32
    %1 = tpu.dynamic_rotate %0 by %c16_i32 dim 1 : vector<32x256xf32>, i32 -> vector<32x256xf32>
    %2 = arith.addf %0, %1 : vector<32x256xf32>
    %c1_i32 = arith.constant 1 : i32
    %3 = tpu.dynamic_rotate %0 by %c1_i32 dim 1 : vector<32x256xf32>, i32 -> vector<32x256xf32>
    %4 = arith.addf %0, %3 : vector<32x256xf32>
    %c1_i32_1 = arith.constant 1 : i32
    %5 = tpu.dynamic_rotate %2 by %c1_i32_1 dim 1 : vector<32x256xf32>, i32 -> vector<32x256xf32>
    %6 = arith.addf %2, %5 : vector<32x256xf32>
    %c1_i32_2 = arith.constant 1 : i32
    %7 = tpu.dynamic_rotate %6 by %c1_i32_2 dim 0 : vector<32x256xf32>, i32 -> vector<32x256xf32>
    %8 = arith.addf %6, %7 : vector<32x256xf32>
    %c1_i32_3 = arith.constant 1 : i32
    %9 = tpu.dynamic_rotate %2 by %c1_i32_3 dim 0 : vector<32x256xf32>, i32 -> vector<32x256xf32>
    %10 = arith.addf %2, %9 : vector<32x256xf32>
    %c1_i32_4 = arith.constant 1 : i32
    %11 = tpu.dynamic_rotate %4 by %c1_i32_4 dim 0 : vector<32x256xf32>, i32 -> vector<32x256xf32>
    %12 = arith.addf %4, %11 : vector<32x256xf32>
    %13 = tpu.iota {dimensions = array<i32: 0>} : vector<32x256xi32>
    %14 = tpu.iota {dimensions = array<i32: 1>} : vector<32x256xi32>
    %c15_i32 = arith.constant 15 : i32
    %15 = vector.broadcast %c15_i32 : i32 to vector<32x256xi32>
    %16 = arith.andi %13, %15 : vector<32x256xi32>
    %c4_i32 = arith.constant 4 : i32
    %17 = vector.broadcast %c4_i32 : i32 to vector<32x256xi32>
    %18 = arith.shrsi %14, %17 : vector<32x256xi32>
    %c15_i32_5 = arith.constant 15 : i32
    %19 = vector.broadcast %c15_i32_5 : i32 to vector<32x256xi32>
    %20 = arith.andi %14, %19 : vector<32x256xi32>
    %c1_i32_6 = arith.constant 1 : i32
    %21 = vector.broadcast %c1_i32_6 : i32 to vector<32x256xi32>
    %22 = arith.cmpi sge, %20, %21 : vector<32x256xi32>
    %c1_i32_7 = arith.constant 1 : i32
    %23 = vector.broadcast %c1_i32_7 : i32 to vector<32x256xi32>
    %24 = arith.cmpi sge, %18, %23 : vector<32x256xi32>
    %25 = arith.andi %22, %24 : vector<32x256xi1>
    %c1_i32_8 = arith.constant 1 : i32
    %26 = vector.broadcast %c1_i32_8 : i32 to vector<32x256xi32>
    %27 = arith.cmpi sge, %16, %26 : vector<32x256xi32>
    %28 = arith.andi %25, %27 : vector<32x256xi1>
    %cst = arith.constant 0.000000e+00 : f32
    %29 = vector.broadcast %cst : f32 to vector<32x256xf32>
    %30 = arith.cmpf one, %8, %29 : vector<32x256xf32>
    %31 = arith.andi %28, %30 : vector<32x256xi1>
    %cst_9 = arith.constant 0.000000e+00 : f32
    %32 = vector.broadcast %cst_9 : f32 to vector<32x256xf32>
    %33 = arith.cmpf oeq, %8, %32 : vector<32x256xf32>
    %cst_10 = arith.constant 1.000000e+00 : f32
    %34 = vector.broadcast %cst_10 : f32 to vector<32x256xf32>
    %35 = arith.select %33, %34, %8 : vector<32x256xi1>, vector<32x256xf32>
    %cst_11 = arith.constant 1.250000e-01 : f32
    %36 = vector.broadcast %cst_11 : f32 to vector<32x256xf32>
    %37 = arith.divf %36, %35 : vector<32x256xf32>
    %38 = arith.sitofp %20 : vector<32x256xi32> to vector<32x256xf32>
    %cst_12 = arith.constant 9.000000e+00 : f32
    %39 = vector.broadcast %cst_12 : f32 to vector<32x256xf32>
    %40 = arith.subf %38, %39 : vector<32x256xf32>
    %cst_13 = arith.constant 1.250000e-01 : f32
    %41 = vector.broadcast %cst_13 : f32 to vector<32x256xf32>
    %42 = arith.mulf %40, %41 : vector<32x256xf32>
    %43 = arith.mulf %10, %37 : vector<32x256xf32>
    %44 = arith.addf %42, %43 : vector<32x256xf32>
    %cst_14 = arith.constant 0.000000e+00 : f32
    %45 = vector.broadcast %cst_14 : f32 to vector<32x256xf32>
    %46 = arith.select %31, %44, %45 : vector<32x256xi1>, vector<32x256xf32>
    %c0_15 = arith.constant 0 : index
    %c0_16 = arith.constant 0 : index
    %c0_17 = arith.constant 0 : index
    %47 = vector.load %arg2[%c0_15, %c0_16, %c0_17] : memref<3x32x256xf32, #tpu.memory_space<vmem>>, vector<1x32x256xf32>
    %48 = vector.shape_cast %47 : vector<1x32x256xf32> to vector<32x256xf32>
    %49 = vector.shape_cast %46 : vector<32x256xf32> to vector<1x32x256xf32>
    tpu.vector_store %arg2[%c0_15, %c0_16, %c0_17], %49 {strides = array<i32>} : memref<3x32x256xf32, #tpu.memory_space<vmem>>, vector<1x32x256xf32>,
    %50 = arith.sitofp %18 : vector<32x256xi32> to vector<32x256xf32>
    %cst_18 = arith.constant 9.000000e+00 : f32
    %51 = vector.broadcast %cst_18 : f32 to vector<32x256xf32>
    %52 = arith.subf %50, %51 : vector<32x256xf32>
    %cst_19 = arith.constant 1.250000e-01 : f32
    %53 = vector.broadcast %cst_19 : f32 to vector<32x256xf32>
    %54 = arith.mulf %52, %53 : vector<32x256xf32>
    %55 = arith.mulf %12, %37 : vector<32x256xf32>
    %56 = arith.addf %54, %55 : vector<32x256xf32>
    %cst_20 = arith.constant 0.000000e+00 : f32
    %57 = vector.broadcast %cst_20 : f32 to vector<32x256xf32>
    %58 = arith.select %31, %56, %57 : vector<32x256xi1>, vector<32x256xf32>
    %c1 = arith.constant 1 : index
    %c0_21 = arith.constant 0 : index
    %c0_22 = arith.constant 0 : index
    %59 = vector.load %arg2[%c1, %c0_21, %c0_22] : memref<3x32x256xf32, #tpu.memory_space<vmem>>, vector<1x32x256xf32>
    %60 = vector.shape_cast %59 : vector<1x32x256xf32> to vector<32x256xf32>
    %61 = vector.shape_cast %58 : vector<32x256xf32> to vector<1x32x256xf32>
    tpu.vector_store %arg2[%c1, %c0_21, %c0_22], %61 {strides = array<i32>} : memref<3x32x256xf32, #tpu.memory_space<vmem>>, vector<1x32x256xf32>,
    %62 = arith.sitofp %16 : vector<32x256xi32> to vector<32x256xf32>
    %cst_23 = arith.constant 9.000000e+00 : f32
    %63 = vector.broadcast %cst_23 : f32 to vector<32x256xf32>
    %64 = arith.subf %62, %63 : vector<32x256xf32>
    %cst_24 = arith.constant 1.250000e-01 : f32
    %65 = vector.broadcast %cst_24 : f32 to vector<32x256xf32>
    %66 = arith.mulf %64, %65 : vector<32x256xf32>
    %67 = arith.mulf %6, %37 : vector<32x256xf32>
    %68 = arith.addf %66, %67 : vector<32x256xf32>
    %cst_25 = arith.constant 0.000000e+00 : f32
    %69 = vector.broadcast %cst_25 : f32 to vector<32x256xf32>
    %70 = arith.select %31, %68, %69 : vector<32x256xi1>, vector<32x256xf32>
    %c2 = arith.constant 2 : index
    %c0_26 = arith.constant 0 : index
    %c0_27 = arith.constant 0 : index
    %71 = vector.load %arg2[%c2, %c0_26, %c0_27] : memref<3x32x256xf32, #tpu.memory_space<vmem>>, vector<1x32x256xf32>
    %72 = vector.shape_cast %71 : vector<1x32x256xf32> to vector<32x256xf32>
    %73 = vector.shape_cast %70 : vector<32x256xf32> to vector<1x32x256xf32>
    tpu.vector_store %arg2[%c2, %c0_26, %c0_27], %73 {strides = array<i32>} : memref<3x32x256xf32, #tpu.memory_space<vmem>>, vector<1x32x256xf32>,
    return
  }
  func.func @transform_0(%arg0: i32) -> (i32, i32) {
    %c0_i32 = arith.constant 0 : i32
    %c0_i32_0 = arith.constant 0 : i32
    return %arg0, %c0_i32 : i32, i32
  }
  func.func @transform_1(%arg0: i32) -> (i32, i32, i32) {
    %c0_i32 = arith.constant 0 : i32
    %c0_i32_0 = arith.constant 0 : i32
    %c0_i32_1 = arith.constant 0 : i32
    return %c0_i32, %arg0, %c0_i32_0 : i32, i32, i32
  }
}

</mosaic_0001>

<bundles_post_ra>
// kernel: tpu_custom_call.1
= control target key start
LH: loop header
LB: loop body
LE: loop exit
PB: predicated region body
PF: predicated region fallthrough
CT: control target
= control target key end

     0   :  { %6 = vsyncpa [#allocation3], 0  ;;  %s1168_s0 = inlined_call_operand.hbm [shape: f32[32,256], index: 0, kind: input, shape index: {}]   ;;  %s1169_s1 = inlined_call_operand.hbm [shape: f32[3,32,256], index: 1, kind: output, shape index: {}]  }
   0x1   :  { %7 = vsyncpa [#allocation4], 0  ;;  %s500_s6 = smov [#allocation2]   ;;  %s452_s10 = scalar_lea.hbm %s1168_s0, 1024 }
   0x2   :  { %s13_s7 = sshll.u32 %s500_s6, 4  ;;  %p453_p0 = scmp.ne.s32.totalorder %s1168_s0, %s452_s10  ;;  %s14_s7 = int_to_ptr.vmem [resolvable:$true] %s13_s7 }
   0x3   :  { %p456_p1 = scmp.lt.u32.totalorder %s452_s10, %s1168_s0 }
   0x5   :  { %p458_p2 = pnand %p456_p1, %p453_p0 }
   0x7   :  { %461 = shalt.err (!%p458_p2)
}
   0x8   :  { %s462_s15 = scalar_lea.vmem %s14_s7, 1024  ;;  %p467_p4 = scmp.lt.s32.totalorder %s14_s7, %s14_s7 }
   0x9   :  { %p463_p3 = scmp.ne.s32.totalorder %s14_s7, %s462_s15  ;;  %p468_p5 = scmp.lt.s32.totalorder %s462_s15, %s462_s15 }
   0xb   :  { %p469_p6 = por %p468_p5, %p467_p4 }
   0xd   :  { %p470_p7 = pnand %p469_p6, %p463_p3 }
   0xf   :  { %473 = shalt.err (!%p470_p7)
}
  0x10   :  { %s501_s16 = smov 256   ;;  %s502_s17 = smov 16  }
  0x11   :  { %19 = dma.hbm_to_vmem [thread:$0]  %s1168_s0, 1024, %s14_s7, [#allocation3], %s501_s16, %s501_s16, %s502_s17  }
  0x12   :  { %496 = dma.done.wait [#allocation3], 1024  }
  0x13   :  { %497 = vsyncadd [#allocation3], 4294966272  ;;  %v530_v0 = vld [vmem:[#allocation2 + $0x20] sm:$0xff]  ;;  %v538_v2 = vld [vmem:[#allocation2 + $0x30] sm:$0xff]  ;;  %v47_v8 = vlaneseq  ;;  %s503_s0 = smov 1   ;;  %s504_s20 = smov [#allocation5]  }
  0x14   :  { %v532_v1 = vld [vmem:[#allocation2] sm:$0xff]  ;;  %35 = vrot.lane.b32.xlu1 %v530_v0, %s502_s17  ;;  %v540_v3 = vld [vmem:[#allocation2 + $0x10] sm:$0xff]  ;;  %v546_v4 = vld [vmem:[#allocation2 + $0x18] sm:$0xff]  ;;  %s411_s21 = sshll.u32 %s504_s20, 4  ;;  %s412_s21 = int_to_ptr.vmem [resolvable:$true] %s411_s21 }
  0x15   :  { %31 = vrot.lane.b32.xlu0 %v532_v1, %s502_s17  ;;  %v548_v5 = vld [vmem:[#allocation2 + $0x8] sm:$0xff]  ;;  %v554_v6 = vld [vmem:[#allocation2 + $0x38] sm:$0xff]  ;;  %v562_v11 = vand.u32 127, %v47_v8  ;;  %v621_v34 = vshrl.u32 %v47_v8, 7  ;;  %s474_s22 = scalar_lea.vmem %s412_s21, 3072  ;;  %p479_p9 = scmp.lt.s32.totalorder %s412_s21, %s412_s21 }
  0x16   :  { %v556_v7 = vld [vmem:[#allocation2 + $0x28] sm:$0xff]  ;;  %p475_p8 = scmp.ne.s32.totalorder %s412_s21, %s474_s22  ;;  %p480_p10 = scmp.lt.s32.totalorder %s474_s22, %s474_s22 }
  0x17   :  { %vm49_vm0 = vcmp.lt.s32.totalorder %v562_v11, 16  ;;  %v624_v35 = vadd.s32 128, %v562_v11  ;;  %v627_v36 = vadd.s32 16, %v621_v34  ;;  %vm1171_vm1 = vcmp.lt.s32.totalorder %v621_v34, 1 }
  0x18   :  { %37 = vrot.lane.b32.xlu1 %v538_v2, %s502_s17  ;;  %v216_v43 = vand.u32 15, %v562_v11  ;;  %v206_v48 = vadd.s32 8, %v621_v34  ;;  %vm1172_vm2 = vcmp.lt.s32.totalorder %v562_v11, 1  ;;  %p481_p11 = por %p480_p10, %p479_p9 }
  0x19   :  { %33 = vrot.lane.b32.xlu0 %v540_v3, %s502_s17  ;;  %v217_v44 = vand.u32 15, %v624_v35  ;;  %v212_v47 = vand.u32 15, %v627_v36 }
  0x1a   :  { %v284_v51 = vcvt.s32.f32 %v216_v43  ;;  %v211_v61 = vand.u32 15, %v206_v48  ;;  %vm795_vm7 = vcmp.ge.s32.totalorder %v216_v43, 1  ;;  %p482_p12 = pnand %p481_p11, %p475_p8 }
  0x1b   :  { %v285_v52 = vcvt.s32.f32 %v217_v44  ;;  %v363_v53 = vcvt.s32.f32 %v212_v47  ;;  %vm813_vm9 = vcmp.ge.s32.totalorder %v217_v44, 1 }
  0x1c   :  { %41 = vrot.lane.b32.xlu1 %v546_v4, %s502_s17  ;;  %v423_v8 = vadd.f32 -9.0, %v284_v51 }
  0x1d   :  { %39 = vrot.lane.b32.xlu0 %v548_v5, %s502_s17 }
  0x20   :  { %45 = vrot.lane.b32.xlu1 %v554_v6, %s502_s17 }
  0x21   :  { %43 = vrot.lane.b32.xlu0 %v556_v7, %s502_s17 }
  0x86   :  { %v36_v9 = vpop.permute.xlu1 %35 }
  0x87   :  { %v32_v10 = vpop.permute.xlu0 %31 }
  0x8a   :  { %v38_v12 = vpop.permute.xlu1 %37 }
  0x8b   :  { %v34_v13 = vpop.permute.xlu0 %33 }
  0x8e   :  { %v42_v14 = vpop.permute.xlu1 %41 }
  0x8f   :  { %v40_v15 = vpop.permute.xlu0 %39  ;;  %v55_v16 = vsel %vm49_vm0, %v42_v14, %v34_v13  ;;  %v51_v25 = vsel %vm49_vm0, %v34_v13, %v42_v14 }
  0x90   :  { %v54_v17 = vsel %vm49_vm0, %v40_v15, %v32_v10  ;;  %v570_v18 = vadd.f32 %v55_v16, %v540_v3  ;;  %v50_v27 = vsel %vm49_vm0, %v32_v10, %v40_v15  ;;  %v594_v28 = vadd.f32 %v51_v25, %v546_v4 }
  0x91   :  { %v573_v19 = vadd.f32 %v54_v17, %v532_v1  ;;  %v597_v29 = vadd.f32 %v50_v27, %v548_v5  ;;  %v208_v10 = vadd.s32 24, %v621_v34  ;;  %v214_v15 = vshra.s32 %v562_v11, 4 }
  0x92   :  { %v46_v20 = vpop.permute.xlu1 %45  ;;  %101 = vrot.lane.b32.xlu1 %v570_v18, %s503_s0  ;;  %v160_v37 = vrot.slane %v570_v18, 7  ;;  %v161_v38 = vrot.slane %v594_v28, 7  ;;  %v429_v16 = vadd.f32 -9.0, %v363_v53 }
  0x93   :  { %99 = vrot.lane.b32.xlu0 %v573_v19, %s503_s0  ;;  %v44_v21 = vpop.permute.xlu0 %43  ;;  %v57_v22 = vsel %vm49_vm0, %v46_v20, %v38_v12  ;;  %v53_v30 = vsel %vm49_vm0, %v38_v12, %v46_v20  ;;  %v158_v39 = vrot.slane %v573_v19, 7  ;;  %v159_v40 = vrot.slane %v597_v29, 7 }
  0x94   :  { %v56_v23 = vsel %vm49_vm0, %v44_v21, %v36_v9  ;;  %v582_v24 = vadd.f32 %v57_v22, %v538_v2  ;;  %v52_v31 = vsel %vm49_vm0, %v36_v9, %v44_v21  ;;  %v606_v32 = vadd.f32 %v53_v30, %v554_v6 }
  0x95   :  { %v587_v26 = vadd.f32 %v56_v23, %v530_v0  ;;  %v609_v33 = vadd.f32 %v52_v31, %v556_v7  ;;  %v170_v54 = vsel %vm1171_vm1, %v158_v39, %v160_v37  ;;  %v171_v55 = vsel %vm1171_vm1, %v159_v40, %v161_v38 }
  0x96   :  { %105 = vrot.lane.b32.xlu1 %v582_v24, %s503_s0  ;;  %v164_v41 = vrot.slane %v582_v24, 7  ;;  %v165_v42 = vrot.slane %v606_v32, 7  ;;  %v424_v9 = vadd.f32 -9.0, %v285_v52  ;;  %v667_v12 = vadd.f32 %v170_v54, %v570_v18 }
  0x97   :  { %103 = vrot.lane.b32.xlu0 %v587_v26, %s503_s0  ;;  %v162_v45 = vrot.slane %v587_v26, 7  ;;  %v163_v46 = vrot.slane %v609_v33, 7  ;;  %v670_v13 = vadd.f32 %v171_v55, %v594_v28  ;;  %v215_v22 = vshra.s32 %v624_v35, 4 }
  0x98   :  { %v172_v56 = vsel %vm1171_vm1, %v164_v41, %v158_v39  ;;  %v173_v57 = vsel %vm1171_vm1, %v165_v42, %v159_v40  ;;  %v362_v30 = vcvt.s32.f32 %v211_v61  ;;  %v210_v39 = vand.u32 15, %v621_v34 }
  0x99   :  { %v166_v58 = vsel %vm1171_vm1, %v162_v45, %v164_v41  ;;  %v167_v59 = vsel %vm1171_vm1, %v163_v46, %v165_v42  ;;  %v168_v60 = vsel %vm1171_vm1, %v160_v37, %v162_v45  ;;  %v169_v62 = vsel %vm1171_vm1, %v161_v38, %v163_v46 }
  0x9a   :  { %109 = vrot.lane.b32.xlu1 %v594_v28, %s503_s0  ;;  %v674_v17 = vadd.f32 %v172_v56, %v573_v19  ;;  %v677_v20 = vadd.f32 %v173_v57, %v597_v29  ;;  %v680_v21 = vadd.f32 %v166_v58, %v582_v24  ;;  %v684_v23 = vadd.f32 %v168_v60, %v587_v26 }
  0x9b   :  { %107 = vrot.lane.b32.xlu0 %v597_v29, %s503_s0  ;;  %v687_v25 = vadd.f32 %v169_v62, %v609_v33  ;;  %v690_v27 = vadd.f32 %v167_v59, %v606_v32  ;;  %v692_v37 = vmul.f32 0.125, %v423_v8  ;;  %v694_v38 = vmul.f32 0.125, %v424_v9 }
  0x9c   :  { %v213_v40 = vand.u32 15, %v208_v10  ;;  %v701_v46 = vmul.f32 0.125, %v429_v16  ;;  %v322_v48 = vcvt.s32.f32 %v214_v15  ;;  %v323_v56 = vcvt.s32.f32 %v215_v22 }
  0x9d   :  { %v361_v59 = vcvt.s32.f32 %v210_v39  ;;  %vm801_vm8 = vcmp.ge.s32.totalorder %v214_v15, 1  ;;  %vm819_vm10 = vcmp.ge.s32.totalorder %v215_v22, 1  ;;  %vm848_vm0 = vcmp.ge.s32.totalorder %v212_v47, 1 }
  0x9e   :  { %113 = vrot.lane.b32.xlu1 %v606_v32, %s503_s0  ;;  %v364_v60 = vcvt.s32.f32 %v213_v40 }
  0x9f   :  { %111 = vrot.lane.b32.xlu0 %v609_v33, %s503_s0 }
  0xa2   :  { %68 = vrot.lane.b32.xlu1 %v540_v3, %s503_s0 }
  0xa3   :  { %66 = vrot.lane.b32.xlu0 %v532_v1, %s503_s0 }
  0xa6   :  { %72 = vrot.lane.b32.xlu1 %v538_v2, %s503_s0 }
  0xa7   :  { %70 = vrot.lane.b32.xlu0 %v530_v0, %s503_s0 }
  0xaa   :  { %76 = vrot.lane.b32.xlu1 %v546_v4, %s503_s0 }
  0xab   :  { %74 = vrot.lane.b32.xlu0 %v548_v5, %s503_s0 }
  0xae   :  { %80 = vrot.lane.b32.xlu1 %v554_v6, %s503_s0 }
  0xaf   :  { %78 = vrot.lane.b32.xlu0 %v556_v7, %s503_s0 }
 0x104   :  { %v102_v49 = vpop.permute.xlu1 %101 }
 0x105   :  { %v100_v50 = vpop.permute.xlu0 %99 }
 0x108   :  { %v106_v63 = vpop.permute.xlu1 %105 }
 0x109   :  { %v104_v14 = vpop.permute.xlu0 %103 }
 0x10c   :  { %v110_v31 = vpop.permute.xlu1 %109 }
 0x10d   :  { %v116_v41 = vsel %vm1172_vm2, %v102_v49, %v110_v31  ;;  %v120_v42 = vsel %vm1172_vm2, %v110_v31, %v102_v49  ;;  %v108_v45 = vpop.permute.xlu0 %107 }
 0x10e   :  { %v706_v51 = vadd.f32 %v120_v42, %v570_v18  ;;  %v709_v52 = vadd.f32 %v116_v41, %v594_v28  ;;  %v115_v53 = vsel %vm1172_vm2, %v100_v50, %v108_v45  ;;  %v119_v54 = vsel %vm1172_vm2, %v108_v45, %v100_v50 }
 0x10f   :  { %v716_v49 = vadd.f32 %v119_v54, %v573_v19  ;;  %v719_v55 = vadd.f32 %v115_v53, %v597_v29  ;;  %v428_v18 = vadd.f32 -9.0, %v362_v30  ;;  %v425_v54 = vadd.f32 -9.0, %v322_v48 }
 0x110   :  { %v133_v57 = vrot.slane %v706_v51, 7  ;;  %v134_v28 = vrot.slane %v709_v52, 7  ;;  %v114_v58 = vpop.permute.xlu1 %113 }
 0x111   :  { %v131_v50 = vrot.slane %v716_v49, 7  ;;  %v132_v19 = vrot.slane %v719_v55, 7  ;;  %v118_v29 = vsel %vm1172_vm2, %v106_v63, %v114_v58  ;;  %v122_v61 = vsel %vm1172_vm2, %v114_v58, %v106_v63  ;;  %v112_v62 = vpop.permute.xlu0 %111 }
 0x112   :  { %v734_v8 = vadd.f32 %v122_v61, %v582_v24  ;;  %v737_v9 = vadd.f32 %v118_v29, %v606_v32  ;;  %v117_v10 = vsel %vm1172_vm2, %v104_v14, %v112_v62  ;;  %v121_v16 = vsel %vm1172_vm2, %v112_v62, %v104_v14 }
 0x113   :  { %v146_v30 = vsel %vm1171_vm1, %v131_v50, %v133_v57  ;;  %v147_v31 = vsel %vm1171_vm1, %v132_v19, %v134_v28  ;;  %v748_v63 = vadd.f32 %v121_v16, %v587_v26  ;;  %v751_v24 = vadd.f32 %v117_v10, %v609_v33 }
 0x114   :  { %v754_v32 = vadd.f32 %v146_v30, %v706_v51  ;;  %v757_v40 = vadd.f32 %v147_v31, %v709_v52  ;;  %v137_v14 = vrot.slane %v734_v8, 7  ;;  %v138_v41 = vrot.slane %v737_v9, 7  ;;  %v69_v42 = vpop.permute.xlu1 %68 }
 0x115   :  { %v135_v45 = vrot.slane %v748_v63, 7  ;;  %v136_v53 = vrot.slane %v751_v24, 7  ;;  %v763_v26 = vpop.permute.xlu0 %66  ;;  %v426_v33 = vadd.f32 -9.0, %v323_v56  ;;  %v427_v58 = vadd.f32 -9.0, %v361_v59 }
 0x116   :  { %vm254_vm3 = vcmp.eq.f32.partialorder %v754_v32, 0.0  ;;  %vm255_vm4 = vcmp.eq.f32.partialorder %v757_v40, 0.0  ;;  %v430_v29 = vadd.f32 -9.0, %v364_v60  ;;  %v148_v10 = vsel %vm1171_vm1, %v137_v14, %v131_v50 }
 0x117   :  { %v262_v61 = vsel %vm254_vm3, 1.0, %v754_v32  ;;  %v263_v62 = vsel %vm255_vm4, 1.0, %v757_v40  ;;  %v149_v16 = vsel %vm1171_vm1, %v138_v41, %v132_v19  ;;  %v774_v48 = vadd.f32 %v148_v10, %v716_v49 }
 0x118   :  { %436 = vrcp.f32 %v262_v61  ;;  %v777_v56 = vadd.f32 %v149_v16, %v719_v55  ;;  %v142_v59 = vsel %vm1171_vm1, %v135_v45, %v137_v14  ;;  %v781_v60 = vpop.permute.xlu1 %72  ;;  %v143_v30 = vsel %vm1171_vm1, %v136_v53, %v138_v41 }
 0x119   :  { %438 = vrcp.f32 %v263_v62  ;;  %v144_v50 = vsel %vm1171_vm1, %v133_v57, %v135_v45  ;;  %v145_v19 = vsel %vm1171_vm1, %v134_v28, %v136_v53  ;;  %v789_v31 = vpop.permute.xlu0 %70  ;;  %vm252_vm5 = vcmp.eq.f32.partialorder %v774_v48, 0.0 }
 0x11a   :  { %vm253_vm6 = vcmp.eq.f32.partialorder %v777_v56, 0.0  ;;  %v805_v57 = vmul.f32 0.125, %v425_v54  ;;  %v807_v28 = vmul.f32 0.125, %v428_v18  ;;  %v260_v45 = vsel %vm252_vm5, 1.0, %v774_v48 }
 0x11b   :  { %v261_v53 = vsel %vm253_vm6, 1.0, %v777_v56  ;;  %v824_v54 = vadd.f32 %v144_v50, %v748_v63  ;;  %v827_v18 = vadd.f32 %v145_v19, %v751_v24  ;;  %v830_v61 = vadd.f32 %v142_v59, %v734_v8 }
 0x11c   :  { %v833_v44 = vadd.f32 %v143_v30, %v737_v9  ;;  %v77_v62 = vpop.permute.xlu1 %76  ;;  %v835_v10 = vmul.f32 0.125, %v426_v33  ;;  %v837_v35 = vmul.f32 0.125, %v427_v58  ;;  %vm238_vm11 = vcmp.ne.f32.partialorder %v754_v32, 0.0 }
 0x11d   :  { %440 = vrcp.f32 %v260_v45  ;;  %vm256_vm12 = vcmp.eq.f32.partialorder %v824_v54, 0.0  ;;  %v841_v22 = vmul.f32 0.125, %v430_v29  ;;  %vm239_vm13 = vcmp.ne.f32.partialorder %v757_v40, 0.0  ;;  %v75_v16 = vpop.permute.xlu0 %74 }
 0x11e   :  { %442 = vrcp.f32 %v261_v53  ;;  %vm257_vm14 = vcmp.eq.f32.partialorder %v827_v18, 0.0  ;;  %vm258_vm15 = vcmp.eq.f32.partialorder %v830_v61, 0.0  ;;  %vm259_vm3 = vcmp.eq.f32.partialorder %v833_v44, 0.0 }
 0x11f   :  { %1181 = vst [vmem:[#allocation8_spill] sm:$0xff] %v841_v22  ;;  %v264_v58 = vsel %vm256_vm12, 1.0, %v824_v54  ;;  %v265_v29 = vsel %vm257_vm14, 1.0, %v827_v18  ;;  %v266_v59 = vsel %vm258_vm15, 1.0, %v830_v61  ;;  %v267_v30 = vsel %vm259_vm3, 1.0, %v833_v44  ;;  %vm895_vm12 = vmand %vm795_vm7, %vm801_vm8 }
 0x120   :  { %444 = vrcp.f32 %v264_v58  ;;  %v84_v50 = vsel %vm1172_vm2, %v69_v42, %v77_v62  ;;  %v88_v36 = vsel %vm1172_vm2, %v77_v62, %v69_v42  ;;  %vm863_vm4 = vcmp.ge.s32.totalorder %v210_v39, 1  ;;  %v81_v19 = vpop.permute.xlu1 %80  ;;  %vm912_vm7 = vmand %vm813_vm9, %vm819_vm10 }
 0x121   :  { %446 = vrcp.f32 %v265_v29  ;;  %v868_v45 = vadd.f32 %v88_v36, %v540_v3  ;;  %v871_v53 = vadd.f32 %v84_v50, %v546_v4  ;;  %v83_v58 = vsel %vm1172_vm2, %v763_v26, %v75_v16  ;;  %vm931_vm9 = vmand %vm895_vm12, %vm238_vm11 }
 0x122   :  { %v437_v22 = vpop.eup %436  ;;  %448 = vrcp.f32 %v266_v59  ;;  %v87_v39 = vsel %vm1172_vm2, %v75_v16, %v763_v26  ;;  %v92_v42 = vadd.f32 %v83_v58, %v548_v5  ;;  %v86_v3 = vsel %vm1172_vm2, %v781_v60, %v81_v19  ;;  %vm946_vm10 = vmand %vm912_vm7, %vm239_vm13 }
 0x123   :  { %v439_v62 = vpop.eup %438  ;;  %vm236_vm5 = vcmp.ne.f32.partialorder %v774_v48, 0.0  ;;  %450 = vrcp.f32 %v267_v30  ;;  %v184_v4 = vrot.slane %v868_v45, 7  ;;  %v185_v29 = vrot.slane %v871_v53, 7  ;;  %vm232_vm11 = vmand %vm895_vm12, %vm848_vm0 }
 0x124   :  { %v273_v50 = vmul.f32 0.125, %v437_v22  ;;  %vm237_vm6 = vcmp.ne.f32.partialorder %v777_v56, 0.0  ;;  %v275_v59 = vmul.f32 0.125, %v439_v62  ;;  %v91_v26 = vadd.f32 %v87_v39, %v532_v1  ;;  %vm228_vm13 = vmand %vm895_vm12, %vm863_vm4 }
 0x125   :  { %v183_v16 = vrot.slane %v92_v42, 7  ;;  %v90_v5 = vsel %vm1172_vm2, %v81_v19, %v781_v60  ;;  %vm240_vm14 = vcmp.ne.f32.partialorder %v824_v54, 0.0  ;;  %v906_v58 = vadd.f32 %v86_v3, %v554_v6  ;;  %vm229_vm15 = vmand %vm912_vm7, %vm863_vm4 }
 0x126   :  { %v292_v22 = vmul.f32 %v273_v50, %v667_v12  ;;  %v375_v36 = vmul.f32 %v273_v50, %v706_v51  ;;  %v903_v1 = vadd.f32 %v90_v5, %v538_v2  ;;  %vm241_vm8 = vcmp.ne.f32.partialorder %v827_v18, 0.0  ;;  %vm233_vm3 = vmand %vm912_vm7, %vm848_vm0 }
 0x127   :  { %v293_v12 = vmul.f32 %v275_v59, %v670_v13  ;;  %v376_v51 = vmul.f32 %v275_v59, %v709_v52  ;;  %v182_v14 = vrot.slane %v91_v26, 7  ;;  %v195_v2 = vsel %vm1171_vm1, %v183_v16, %v185_v29  ;;  %v441_v6 = vpop.eup %440  ;;  %vm1051_vm4 = vmand %vm233_vm3, %vm241_vm8 }
 0x128   :  { %v300_v41 = vadd.f32 %v292_v22, %v692_v37  ;;  %v383_v43 = vadd.f32 %v375_v36, %v807_v28  ;;  %v201_v15 = vadd.f32 %v195_v2, %v871_v53  ;;  %v188_v19 = vrot.slane %v903_v1, 7  ;;  %v443_v39 = vpop.eup %442 }
 0x129   :  { %v301_v52 = vadd.f32 %v293_v12, %v694_v38  ;;  %v384_v3 = vadd.f32 %v376_v51, %v807_v28  ;;  %v194_v62 = vsel %vm1171_vm1, %v182_v14, %v184_v4  ;;  %v189_v5 = vrot.slane %v906_v58, 7 }
 0x12a   :  { %v308_v22 = vsel %vm931_vm9, %v300_v41, 0.0  ;;  %v391_v28 = vsel %vm931_vm9, %v383_v43, 0.0  ;;  %v200_v36 = vadd.f32 %v194_v62, %v868_v45  ;;  %v331_v12 = vmul.f32 %v275_v59, %v201_v15  ;;  %v445_v51 = vpop.eup %444 }
 0x12b   :  { %v309_v40 = vsel %vm946_vm10, %v301_v52, 0.0  ;;  %316 = vst [vmem:[#allocation5 + $0x10] sm:$0xff] %v308_v22  ;;  %v392_v2 = vsel %vm946_vm10, %v384_v3, 0.0  ;;  %400 = vst [vmem:[#allocation5 + $0x90] sm:$0xff] %v391_v28  ;;  %v196_v41 = vsel %vm1171_vm1, %v188_v19, %v182_v14  ;;  %v197_v59 = vsel %vm1171_vm1, %v189_v5, %v183_v16  ;;  %v447_v43 = vpop.eup %446 }
 0x12c   :  { %v971_v15 = vmul.f32 0.125, %v445_v51  ;;  %317 = vst [vmem:[#allocation5 + $0x18] sm:$0xff] %v309_v40  ;;  %401 = vst [vmem:[#allocation5 + $0x98] sm:$0xff] %v392_v2  ;;  %v330_v52 = vmul.f32 %v273_v50, %v200_v36  ;;  %v339_v62 = vadd.f32 %v331_v12, %v835_v10  ;;  %v198_v3 = vadd.f32 %v196_v41, %v91_v26  ;;  %v449_v14 = vpop.eup %448 }
 0x12d   :  { %v978_v22 = vmul.f32 0.125, %v447_v43  ;;  %v199_v16 = vadd.f32 %v197_v59, %v92_v42  ;;  %v269_v28 = vmul.f32 0.125, %v441_v6  ;;  %v271_v51 = vmul.f32 0.125, %v443_v39  ;;  %v451_v50 = vpop.eup %450  ;;  %vm1008_vm1 = vmand %vm228_vm13, %vm236_vm5 }
 0x12e   :  { %v294_v26 = vmul.f32 %v971_v15, %v684_v23  ;;  %v377_v36 = vmul.f32 %v971_v15, %v748_v63  ;;  %v338_v12 = vadd.f32 %v330_v52, %v805_v57  ;;  %v347_v42 = vsel %vm946_vm10, %v339_v62, 0.0  ;;  %vm1025_vm5 = vmand %vm229_vm15, %vm237_vm6  ;;  %v79_v52 = vpop.permute.xlu0 %78 }
 0x12f   :  { %vm243_vm2 = vcmp.ne.f32.partialorder %v833_v44, 0.0  ;;  %v295_v6 = vmul.f32 %v978_v22, %v687_v25  ;;  %v378_v39 = vmul.f32 %v978_v22, %v751_v24  ;;  %356 = vst [vmem:[#allocation5 + $0x58] sm:$0xff] %v347_v42  ;;  %v290_v63 = vmul.f32 %v269_v28, %v674_v17 }
 0x130   :  { %v291_v32 = vmul.f32 %v271_v51, %v677_v20  ;;  %v302_v25 = vadd.f32 %v294_v26, %v692_v37  ;;  %v385_v24 = vadd.f32 %v377_v36, %v701_v46  ;;  %v346_v48 = vsel %vm931_vm9, %v338_v12, 0.0  ;;  %vm1036_vm9 = vmand %vm232_vm11, %vm240_vm14 }
 0x131   :  { %v328_v17 = vmul.f32 %v269_v28, %v198_v3  ;;  %v303_v56 = vadd.f32 %v295_v6, %v694_v38  ;;  %v386_v47 = vadd.f32 %v378_v39, %v701_v46  ;;  %355 = vst [vmem:[#allocation5 + $0x50] sm:$0xff] %v346_v48  ;;  %v298_v13 = vadd.f32 %v290_v63, %v692_v37 }
 0x132   :  { %v299_v2 = vadd.f32 %v291_v32, %v694_v38  ;;  %v310_v41 = vsel %vm1036_vm9, %v302_v25, 0.0  ;;  %v393_v46 = vsel %vm1036_vm9, %v385_v24, 0.0  ;;  %v329_v59 = vmul.f32 %v271_v51, %v199_v16 }
 0x133   :  { %v336_v43 = vadd.f32 %v328_v17, %v805_v57  ;;  %v311_v18 = vsel %vm1051_vm4, %v303_v56, 0.0  ;;  %318 = vst [vmem:[#allocation5 + $0x20] sm:$0xff] %v310_v41  ;;  %v394_v33 = vsel %vm1051_vm4, %v386_v47, 0.0  ;;  %402 = vst [vmem:[#allocation5 + $0xa0] sm:$0xff] %v393_v46  ;;  %v306_v62 = vsel %vm1008_vm1, %v298_v13, 0.0 }
 0x134   :  { %v307_v3 = vsel %vm1025_vm5, %v299_v2, 0.0  ;;  %319 = vst [vmem:[#allocation5 + $0x28] sm:$0xff] %v311_v18  ;;  %403 = vst [vmem:[#allocation5 + $0xa8] sm:$0xff] %v394_v33  ;;  %v337_v16 = vadd.f32 %v329_v59, %v835_v10  ;;  %v373_v36 = vmul.f32 %v269_v28, %v716_v49  ;;  %v374_v12 = vmul.f32 %v271_v51, %v719_v55 }
 0x135   :  { %314 = vst [vmem:[#allocation5] sm:$0xff] %v306_v62  ;;  %315 = vst [vmem:[#allocation5 + $0x8] sm:$0xff] %v307_v3  ;;  %v344_v26 = vsel %vm1008_vm1, %v336_v43, 0.0  ;;  %v281_v42 = vmul.f32 0.125, %v449_v14  ;;  %v283_v6 = vmul.f32 0.125, %v451_v50  ;;  %vm1202_vm0 = vcmp.lt.s32.totalorder %v562_v11, 1 }
 0x136   :  { %353 = vst [vmem:[#allocation5 + $0x40] sm:$0xff] %v344_v26  ;;  %v85_v39 = vsel %vm1202_vm0, %v789_v31, %v79_v52  ;;  %vm1203_vm6 = vmmov %vm1202_vm0  ;;  %v345_v32 = vsel %vm1025_vm5, %v337_v16, 0.0  ;;  %v381_v25 = vadd.f32 %v373_v36, %v837_v35  ;;  %v382_v49 = vadd.f32 %v374_v12, %v837_v35 }
 0x137   :  { %v89_v63 = vsel %vm1203_vm6, %v79_v52, %v789_v31  ;;  %354 = vst [vmem:[#allocation5 + $0x48] sm:$0xff] %v345_v32  ;;  %v296_v14 = vmul.f32 %v281_v42, %v680_v21  ;;  %v297_v28 = vmul.f32 %v283_v6, %v690_v27  ;;  %v379_v51 = vmul.f32 %v281_v42, %v734_v8  ;;  %v1207_v8 = vld [vmem:[#allocation8_spill] sm:$0xff] }
 0x138   :  { %v95_v55 = vadd.f32 %v89_v63, %v530_v0  ;;  %v380_v50 = vmul.f32 %v283_v6, %v737_v9  ;;  %v389_v11 = vsel %vm1008_vm1, %v381_v25, 0.0  ;;  %v390_v31 = vsel %vm1025_vm5, %v382_v49, 0.0  ;;  %vm1109_vm1 = vmand %vm912_vm7, %vm243_vm2 }
 0x139   :  { %v96_v24 = vadd.f32 %v85_v39, %v556_v7  ;;  %vm1204_vm14 = vcmp.ne.f32.partialorder %v830_v61, 0.0  ;;  %398 = vst [vmem:[#allocation5 + $0x80] sm:$0xff] %v389_v11  ;;  %399 = vst [vmem:[#allocation5 + $0x88] sm:$0xff] %v390_v31  ;;  %v304_v21 = vadd.f32 %v296_v14, %v692_v37  ;;  %v305_v27 = vadd.f32 %v297_v28, %v694_v38 }
 0x13a   :  { %v186_v35 = vrot.slane %v95_v55, 7  ;;  %vm1097_vm8 = vmand %vm895_vm12, %vm1204_vm14  ;;  %v387_v9 = vadd.f32 %v379_v51, %v1207_v8  ;;  %v388_v23 = vadd.f32 %v380_v50, %v1207_v8  ;;  %vm1210_vm12 = vcmp.lt.s32.totalorder %v621_v34, 1 }
 0x13b   :  { %v187_v61 = vrot.slane %v96_v24, 7  ;;  %vm1211_vm10 = vmmov %vm1210_vm12  ;;  %v312_v44 = vsel %vm1097_vm8, %v304_v21, 0.0  ;;  %v313_v30 = vsel %vm1109_vm1, %v305_v27, 0.0 }
 0x13c   :  { %v190_v37 = vsel %vm1210_vm12, %v186_v35, %v188_v19  ;;  %v192_v38 = vsel %vm1211_vm10, %v184_v4, %v186_v35  ;;  %v395_v60 = vsel %vm1097_vm8, %v387_v9, 0.0  ;;  %v396_v48 = vsel %vm1109_vm1, %v388_v23, 0.0  ;;  %320 = vst [vmem:[#allocation5 + $0x30] sm:$0xff] %v312_v44  ;;  %321 = vst [vmem:[#allocation5 + $0x38] sm:$0xff] %v313_v30 }
 0x13d   :  { %404 = vst [vmem:[#allocation5 + $0xb0] sm:$0xff] %v395_v60  ;;  %405 = vst [vmem:[#allocation5 + $0xb8] sm:$0xff] %v396_v48  ;;  %v202_v19 = vadd.f32 %v192_v38, %v95_v55  ;;  %v204_v40 = vadd.f32 %v190_v37, %v903_v1 }
 0x13e   :  { %vm1212_vm2 = vmmov %vm1211_vm10 }
 0x13f   :  { %v191_v45 = vsel %vm1212_vm2, %v187_v61, %v189_v5  ;;  %vm1213_vm7 = vmmov %vm1212_vm2  ;;  %v332_v47 = vmul.f32 %v971_v15, %v202_v19  ;;  %v334_v13 = vmul.f32 %v281_v42, %v204_v40 }
 0x140   :  { %v193_v4 = vsel %vm1213_vm7, %v185_v29, %v187_v61  ;;  %v205_v56 = vadd.f32 %v191_v45, %v906_v58 }
 0x141   :  { %v203_v17 = vadd.f32 %v193_v4, %v96_v24  ;;  %v340_v5 = vadd.f32 %v332_v47, %v805_v57  ;;  %v342_v53 = vadd.f32 %v334_v13, %v805_v57 }
 0x142   :  { %v335_v41 = vmul.f32 %v283_v6, %v205_v56 }
 0x143   :  { %v333_v2 = vmul.f32 %v978_v22, %v203_v17  ;;  %v348_v1 = vsel %vm1036_vm9, %v340_v5, 0.0  ;;  %v350_v58 = vsel %vm1097_vm8, %v342_v53, 0.0 }
 0x144   :  { %v343_v29 = vadd.f32 %v335_v41, %v835_v10  ;;  %357 = vst [vmem:[#allocation5 + $0x60] sm:$0xff] %v348_v1  ;;  %359 = vst [vmem:[#allocation5 + $0x70] sm:$0xff] %v350_v58 }
 0x145   :  { %v341_v34 = vadd.f32 %v333_v2, %v835_v10 }
 0x146   :  { %v351_v22 = vsel %vm1109_vm1, %v343_v29, 0.0 }
 0x147   :  { %v349_v15 = vsel %vm1051_vm4, %v341_v34, 0.0  ;;  %360 = vst [vmem:[#allocation5 + $0x78] sm:$0xff] %v351_v22 }
 0x148   :  { %358 = vst [vmem:[#allocation5 + $0x68] sm:$0xff] %v349_v15 }
 0x149   :  { %485 = shalt.err (!%p482_p12)
}
 0x14a   :  { %s486_s25 = scalar_lea.hbm %s1169_s1, 3072 }
 0x14b   :  { %p487_p13 = scmp.ne.s32.totalorder %s1169_s1, %s486_s25  ;;  %p490_p0 = scmp.lt.u32.totalorder %s486_s25, %s1169_s1 }
 0x14d   :  { %p492_p1 = pnand %p490_p0, %p487_p13 }
 0x14f   :  { %495 = shalt.err (!%p492_p1)
}
 0x150   :  { %417 = dma.vmem_to_hbm [thread:$0]  %s412_s21, 3072, %s1169_s1, [#allocation4], %s501_s16, %s501_s16, %s502_s17  }
 0x151   :  { %498 = dma.done.wait [#allocation4], 3072  }
 0x152   :  { %499 = vsyncadd [#allocation4], 4294964224 }
 0x153   :  { %421 = vsyncpa [#allocation3], 1 }
 0x154   :  { %422 = vsyncpa [#allocation4], 1 }

</bundles_post_ra>
